<compile_context>
chip_gen: v5e
topology: v5e:2x2
jax: 0.10.0
libtpu: 0.0.40
codegen_flags: <defaults>
</compile_context>

<pallas_src>
import numpy as np

import jax
import jax.numpy as jnp
from jax.experimental import pallas as pl
from jax.experimental.pallas import tpu as pltpu


# ---------------------------------------------------------------------------
# Fused Pallas kernel: whole network forward
# ---------------------------------------------------------------------------

def _resnet_fused_kernel(
    x_ref,
    stem_l, stem_r,
    r1_pj_l, r1_pj_r, r1_dw_l, r1_dw_r, r1_pw_r,
    r2_pj_l, r2_pj_r, r2_dw_l, r2_dw_r, r2_pw_r,
    head_l, head_r, head_b,
    out_ref,
):
    def mxu(a, b):
        # bf16 operands (MXU-native on v6e/v7x), f32 accumulation.
        return jnp.dot(a.astype(jnp.bfloat16), b.astype(jnp.bfloat16),
                       preferred_element_type=jnp.float32)

    def conv(x, l_ref, r_ref):
        # GenericConv as  sum_ki  L_ki @ X @ R_ki   (taps statically unrolled).
        acc = mxu(mxu(l_ref[0], x), r_ref[0])
        for ki in range(1, l_ref.shape[0]):
            acc = acc + mxu(mxu(l_ref[ki], x), r_ref[ki])
        return acc

    def relu(v):
        return jnp.maximum(v, 0.0)

    x0 = x_ref[...]                                   # (N*16, 16*4)

    # stem: GenericConv(in_ch, stem, 3, stride=1, padding=1)
    y = relu(conv(x0, stem_l, stem_r))                # (N*16, 16*8)

    # Block layers (SelectOp -> nn.Identity candidate): no-op.

    # Reduction 1: proj 2x2/s2, depthwise 3x3/s2, 1x1 pointwise, residual add.
    p = relu(conv(y, r1_pj_l, r1_pj_r))               # (N*8, 8*12)
    d = relu(conv(y, r1_dw_l, r1_dw_r))               # (N*8, 8*8)
    y = relu(mxu(d, r1_pw_r[...])) + p                # (N*8, 8*12)

    # Reduction 2
    p = relu(conv(y, r2_pj_l, r2_pj_r))               # (N*4, 4*18)
    d = relu(conv(y, r2_dw_l, r2_dw_r))               # (N*4, 4*12)
    y = relu(mxu(d, r2_pw_r[...])) + p                # (N*4, 4*18)

    # AdaptiveAvgPool2d(1) + Flatten + Linear (pool folded into head L/R).
    pooled = mxu(head_l[...], y)                      # (N, 4*18): summed over rows
    out_ref[...] = mxu(pooled, head_r[...]) + head_b[...]


# ---------------------------------------------------------------------------
# Host-side construction of the constant structure matrices
# ---------------------------------------------------------------------------

def _conv_struct_mats(weight, batch, h, w, stride, pad):
    """Express a conv on the 2-D layout X[n*H+h, w*Cin+c] as sum_ki L_ki@X@R_ki.

    weight: (K, K, Cin, Cout) numpy array.
    Returns (L: (K, batch*OH, batch*H), R: (K, W*Cin, OW*Cout), OH, OW).
    L encodes H-tap row selection (and zero padding); R encodes W-taps +
    channel mixing (and zero padding).
    """
    k, _, cin, cout = weight.shape
    oh = (h + 2 * pad - k) // stride + 1
    ow = (w + 2 * pad - k) // stride + 1
    L = np.zeros((k, batch * oh, batch * h), np.float32)
    R = np.zeros((k, w * cin, ow * cout), np.float32)
    for ki in range(k):
        for n in range(batch):
            for o in range(oh):
                hi = stride * o + ki - pad
                if 0 <= hi < h:
                    L[ki, n * oh + o, n * h + hi] = 1.0
        for o in range(ow):
            for kj in range(k):
                wi = stride * o + kj - pad
                if 0 <= wi < w:
                    R[ki, wi * cin:(wi + 1) * cin,
                      o * cout:(o + 1) * cout] = weight[ki, kj]
    return L, R, oh, ow


def _depthwise_to_dense(w_dw):
    """(K, K, C) depthwise weights -> equivalent dense (K, K, C, C)."""
    k, _, c = w_dw.shape
    dense = np.zeros((k, k, c, c), np.float32)
    for i in range(c):
        dense[:, :, i, i] = w_dw[:, :, i]
    return dense


def _head_struct_mats(batch, h, w, c, w_cls, b_cls):
    """AdaptiveAvgPool2d(1)+Flatten+Linear folded into L (row sum) / R."""
    L = np.zeros((batch, batch * h), np.float32)
    for n in range(batch):
        L[n, n * h:(n + 1) * h] = 1.0
    R = np.zeros((w * c, w_cls.shape[1]), np.float32)
    for wi in range(w):
        R[wi * c:(wi + 1) * c, :] = w_cls / float(h * w)
    return L, R, b_cls.reshape(1, -1)


def init_model(key, batch, in_ch, h, w, stem=8, blocks=(1, 1),
               channels_scale=1.5, num_classes=10):
    """Deterministic init; returns the flat tuple of constant kernel operands."""
    keys = iter(jax.random.split(key, 16))

    def nrm(shape, scale=0.1):
        return np.asarray(jax.random.normal(next(keys), shape,
                                            dtype=jnp.float32)) * scale

    consts = []
    # stem: 3x3, stride 1, pad 1, in_ch -> stem
    L, R, h, w = _conv_struct_mats(nrm((3, 3, in_ch, stem)), batch, h, w, 1, 1)
    consts += [L, R]

    channels = stem
    for _ in blocks:
        out_ch = int(channels * channels_scale)
        # Reduction.proj: 2x2, stride 2, pad 0
        l_pj, r_pj, oh, ow = _conv_struct_mats(
            nrm((2, 2, channels, out_ch)), batch, h, w, 2, 0)
        # Reduction.conv1: depthwise 3x3, stride 2, pad 1
        l_dw, r_dw, oh2, ow2 = _conv_struct_mats(
            _depthwise_to_dense(nrm((3, 3, channels))), batch, h, w, 2, 1)
        assert (oh, ow) == (oh2, ow2)
        # Reduction.conv2: 1x1 pointwise (its L is identity -> dropped)
        _, r_pw, _, _ = _conv_struct_mats(
            nrm((channels, out_ch)).reshape(1, 1, channels, out_ch),
            batch, oh, ow, 1, 0)
        consts += [l_pj, r_pj, l_dw, r_dw, r_pw[0]]
        channels, h, w = out_ch, oh, ow

    # classifier head (global-average-pool folded in)
    l_h, r_h, b_h = _head_struct_mats(batch, h, w, channels,
                                      nrm((channels, num_classes)),
                                      nrm((num_classes,)))
    consts += [l_h, r_h, b_h]

    # MXU operands in bf16 (halves constant DMA bytes); bias stays f32.
    out = [jnp.asarray(a, dtype=jnp.bfloat16) for a in consts[:-1]]
    out.append(jnp.asarray(consts[-1], dtype=jnp.float32))
    return tuple(out)


# ---------------------------------------------------------------------------
# Forward wrapper: single pallas_call, whole arrays VMEM-resident, no grid
# ---------------------------------------------------------------------------

def resnet_forward(x_nchw, consts):
    n, c, h, w = x_nchw.shape
    num_classes = consts[-1].shape[-1]
    # One-time layout change of the network INPUT only (NCHW -> row matrix
    # X[n*H+h, w*C+c]); every later layout concern lives inside the kernel.
    x2d = jnp.transpose(x_nchw, (0, 2, 3, 1)).reshape(n * h, w * c)
    x2d = x2d.astype(jnp.float32)
    operands = (x2d,) + tuple(consts)
    return pl.pallas_call(
        _resnet_fused_kernel,
        out_shape=jax.ShapeDtypeStruct((n, num_classes), jnp.float32),
        in_specs=[pl.BlockSpec(memory_space=pltpu.MemorySpace.VMEM)
                  for _ in operands],
        out_specs=pl.BlockSpec(memory_space=pltpu.MemorySpace.VMEM),
    )(*operands)


# ---------------------------------------------------------------------------
# Driver
# ---------------------------------------------------------------------------

if __name__ == "__main__":
    # Config consistent with:
    #   ResNetModel(stem=8, num_classes=10, blocks=[1, 1], channels_scale=1.5,
    #               reduce=[True, True], input_size=(2, 4, 16, 16))
    key = jax.random.PRNGKey(0)
    kx, kp = jax.random.split(key)

    batch, in_ch, spatial = 2, 4, 16
    x = jax.random.normal(kx, (batch, in_ch, spatial, spatial),
                          dtype=jnp.float32)  # NCHW like the PyTorch module

    consts = init_model(kp, batch, in_ch, spatial, spatial,
                        stem=8, blocks=(1, 1), channels_scale=1.5,
                        num_classes=10)

    fwd = jax.jit(resnet_forward)
    out = jax.block_until_ready(fwd(x, consts))

    assert out.shape == (batch, 10), out.shape
    assert bool(jnp.all(jnp.isfinite(out)))
    print("KERNEL_OK")
</pallas_src>

<mosaic_0001>
module attributes {stable_mosaic.version = 11 : i64} {
  func.func @_resnet_fused_kernel(%arg0: memref<32x64xf32, #tpu.memory_space<vmem>>, %arg1: memref<3x32x32xbf16, #tpu.memory_space<vmem>>, %arg2: memref<3x64x128xbf16, #tpu.memory_space<vmem>>, %arg3: memref<2x16x32xbf16, #tpu.memory_space<vmem>>, %arg4: memref<2x128x96xbf16, #tpu.memory_space<vmem>>, %arg5: memref<3x16x32xbf16, #tpu.memory_space<vmem>>, %arg6: memref<3x128x64xbf16, #tpu.memory_space<vmem>>, %arg7: memref<64x96xbf16, #tpu.memory_space<vmem>>, %arg8: memref<2x8x16xbf16, #tpu.memory_space<vmem>>, %arg9: memref<2x96x72xbf16, #tpu.memory_space<vmem>>, %arg10: memref<3x8x16xbf16, #tpu.memory_space<vmem>>, %arg11: memref<3x96x48xbf16, #tpu.memory_space<vmem>>, %arg12: memref<48x72xbf16, #tpu.memory_space<vmem>>, %arg13: memref<2x8xbf16, #tpu.memory_space<vmem>>, %arg14: memref<72x10xbf16, #tpu.memory_space<vmem>>, %arg15: memref<1x10xf32, #tpu.memory_space<vmem>>, %arg16: memref<2x10xf32, #tpu.memory_space<vmem>>) attributes {dimension_semantics = [], scalar_prefetch = 0 : i64, scratch_operands = 0 : i64, tpu.core_type = #tpu.core_type<tc>} {
    %c0 = arith.constant 0 : index
    %c0_0 = arith.constant 0 : index
    %0 = vector.load %arg0[%c0, %c0_0] : memref<32x64xf32, #tpu.memory_space<vmem>>, vector<32x64xf32>
    %c0_1 = arith.constant 0 : index
    %c0_2 = arith.constant 0 : index
    %c0_3 = arith.constant 0 : index
    %1 = vector.load %arg1[%c0_1, %c0_2, %c0_3] : memref<3x32x32xbf16, #tpu.memory_space<vmem>>, vector<1x32x32xbf16>
    %2 = vector.shape_cast %1 : vector<1x32x32xbf16> to vector<32x32xbf16>
    %3 = arith.truncf %0 : vector<32x64xf32> to vector<32x64xbf16>
    %cst = arith.constant dense<0.000000e+00> : vector<32x64xf32>
    %4 = tpu.matmul %2, %3, %cst {dimension_numbers = #tpu.dot_dimension_numbers<[1], [0], [0], [1], [0, 0, 1, 1], [], []>} : vector<32x32xbf16>, vector<32x64xbf16>, vector<32x64xf32> -> vector<32x64xf32>
    %c0_4 = arith.constant 0 : index
    %c0_5 = arith.constant 0 : index
    %c0_6 = arith.constant 0 : index
    %5 = vector.load %arg2[%c0_4, %c0_5, %c0_6] : memref<3x64x128xbf16, #tpu.memory_space<vmem>>, vector<1x64x128xbf16>
    %6 = vector.shape_cast %5 : vector<1x64x128xbf16> to vector<64x128xbf16>
    %7 = arith.truncf %4 : vector<32x64xf32> to vector<32x64xbf16>
    %cst_7 = arith.constant dense<0.000000e+00> : vector<32x128xf32>
    %8 = tpu.matmul %7, %6, %cst_7 {dimension_numbers = #tpu.dot_dimension_numbers<[1], [0], [0], [1], [0, 0, 1, 1], [], []>} : vector<32x64xbf16>, vector<64x128xbf16>, vector<32x128xf32> -> vector<32x128xf32>
    %c1 = arith.constant 1 : index
    %c0_8 = arith.constant 0 : index
    %c0_9 = arith.constant 0 : index
    %9 = vector.load %arg1[%c1, %c0_8, %c0_9] : memref<3x32x32xbf16, #tpu.memory_space<vmem>>, vector<1x32x32xbf16>
    %10 = vector.shape_cast %9 : vector<1x32x32xbf16> to vector<32x32xbf16>
    %11 = arith.truncf %0 : vector<32x64xf32> to vector<32x64xbf16>
    %cst_10 = arith.constant dense<0.000000e+00> : vector<32x64xf32>
    %12 = tpu.matmul %10, %11, %cst_10 {dimension_numbers = #tpu.dot_dimension_numbers<[1], [0], [0], [1], [0, 0, 1, 1], [], []>} : vector<32x32xbf16>, vector<32x64xbf16>, vector<32x64xf32> -> vector<32x64xf32>
    %c1_11 = arith.constant 1 : index
    %c0_12 = arith.constant 0 : index
    %c0_13 = arith.constant 0 : index
    %13 = vector.load %arg2[%c1_11, %c0_12, %c0_13] : memref<3x64x128xbf16, #tpu.memory_space<vmem>>, vector<1x64x128xbf16>
    %14 = vector.shape_cast %13 : vector<1x64x128xbf16> to vector<64x128xbf16>
    %15 = arith.truncf %12 : vector<32x64xf32> to vector<32x64xbf16>
    %cst_14 = arith.constant dense<0.000000e+00> : vector<32x128xf32>
    %16 = tpu.matmul %15, %14, %cst_14 {dimension_numbers = #tpu.dot_dimension_numbers<[1], [0], [0], [1], [0, 0, 1, 1], [], []>} : vector<32x64xbf16>, vector<64x128xbf16>, vector<32x128xf32> -> vector<32x128xf32>
    %17 = arith.addf %8, %16 : vector<32x128xf32>
    %c2 = arith.constant 2 : index
    %c0_15 = arith.constant 0 : index
    %c0_16 = arith.constant 0 : index
    %18 = vector.load %arg1[%c2, %c0_15, %c0_16] : memref<3x32x32xbf16, #tpu.memory_space<vmem>>, vector<1x32x32xbf16>
    %19 = vector.shape_cast %18 : vector<1x32x32xbf16> to vector<32x32xbf16>
    %20 = arith.truncf %0 : vector<32x64xf32> to vector<32x64xbf16>
    %cst_17 = arith.constant dense<0.000000e+00> : vector<32x64xf32>
    %21 = tpu.matmul %19, %20, %cst_17 {dimension_numbers = #tpu.dot_dimension_numbers<[1], [0], [0], [1], [0, 0, 1, 1], [], []>} : vector<32x32xbf16>, vector<32x64xbf16>, vector<32x64xf32> -> vector<32x64xf32>
    %c2_18 = arith.constant 2 : index
    %c0_19 = arith.constant 0 : index
    %c0_20 = arith.constant 0 : index
    %22 = vector.load %arg2[%c2_18, %c0_19, %c0_20] : memref<3x64x128xbf16, #tpu.memory_space<vmem>>, vector<1x64x128xbf16>
    %23 = vector.shape_cast %22 : vector<1x64x128xbf16> to vector<64x128xbf16>
    %24 = arith.truncf %21 : vector<32x64xf32> to vector<32x64xbf16>
    %cst_21 = arith.constant dense<0.000000e+00> : vector<32x128xf32>
    %25 = tpu.matmul %24, %23, %cst_21 {dimension_numbers = #tpu.dot_dimension_numbers<[1], [0], [0], [1], [0, 0, 1, 1], [], []>} : vector<32x64xbf16>, vector<64x128xbf16>, vector<32x128xf32> -> vector<32x128xf32>
    %26 = arith.addf %17, %25 : vector<32x128xf32>
    %cst_22 = arith.constant 0.000000e+00 : f32
    %27 = vector.broadcast %cst_22 : f32 to vector<32x128xf32>
    %28 = arith.maximumf %26, %27 : vector<32x128xf32>
    %c0_23 = arith.constant 0 : index
    %c0_24 = arith.constant 0 : index
    %c0_25 = arith.constant 0 : index
    %29 = vector.load %arg3[%c0_23, %c0_24, %c0_25] : memref<2x16x32xbf16, #tpu.memory_space<vmem>>, vector<1x16x32xbf16>
    %30 = vector.shape_cast %29 : vector<1x16x32xbf16> to vector<16x32xbf16>
    %31 = arith.truncf %28 : vector<32x128xf32> to vector<32x128xbf16>
    %cst_26 = arith.constant dense<0.000000e+00> : vector<16x128xf32>
    %32 = tpu.matmul %30, %31, %cst_26 {dimension_numbers = #tpu.dot_dimension_numbers<[1], [0], [0], [1], [0, 0, 1, 1], [], []>} : vector<16x32xbf16>, vector<32x128xbf16>, vector<16x128xf32> -> vector<16x128xf32>
    %c0_27 = arith.constant 0 : index
    %c0_28 = arith.constant 0 : index
    %c0_29 = arith.constant 0 : index
    %33 = vector.load %arg4[%c0_27, %c0_28, %c0_29] : memref<2x128x96xbf16, #tpu.memory_space<vmem>>, vector<1x128x96xbf16>
    %34 = vector.shape_cast %33 : vector<1x128x96xbf16> to vector<128x96xbf16>
    %35 = arith.truncf %32 : vector<16x128xf32> to vector<16x128xbf16>
    %cst_30 = arith.constant dense<0.000000e+00> : vector<16x96xf32>
    %36 = tpu.matmul %35, %34, %cst_30 {dimension_numbers = #tpu.dot_dimension_numbers<[1], [0], [0], [1], [0, 0, 1, 1], [], []>} : vector<16x128xbf16>, vector<128x96xbf16>, vector<16x96xf32> -> vector<16x96xf32>
    %c1_31 = arith.constant 1 : index
    %c0_32 = arith.constant 0 : index
    %c0_33 = arith.constant 0 : index
    %37 = vector.load %arg3[%c1_31, %c0_32, %c0_33] : memref<2x16x32xbf16, #tpu.memory_space<vmem>>, vector<1x16x32xbf16>
    %38 = vector.shape_cast %37 : vector<1x16x32xbf16> to vector<16x32xbf16>
    %39 = arith.truncf %28 : vector<32x128xf32> to vector<32x128xbf16>
    %cst_34 = arith.constant dense<0.000000e+00> : vector<16x128xf32>
    %40 = tpu.matmul %38, %39, %cst_34 {dimension_numbers = #tpu.dot_dimension_numbers<[1], [0], [0], [1], [0, 0, 1, 1], [], []>} : vector<16x32xbf16>, vector<32x128xbf16>, vector<16x128xf32> -> vector<16x128xf32>
    %c1_35 = arith.constant 1 : index
    %c0_36 = arith.constant 0 : index
    %c0_37 = arith.constant 0 : index
    %41 = vector.load %arg4[%c1_35, %c0_36, %c0_37] : memref<2x128x96xbf16, #tpu.memory_space<vmem>>, vector<1x128x96xbf16>
    %42 = vector.shape_cast %41 : vector<1x128x96xbf16> to vector<128x96xbf16>
    %43 = arith.truncf %40 : vector<16x128xf32> to vector<16x128xbf16>
    %cst_38 = arith.constant dense<0.000000e+00> : vector<16x96xf32>
    %44 = tpu.matmul %43, %42, %cst_38 {dimension_numbers = #tpu.dot_dimension_numbers<[1], [0], [0], [1], [0, 0, 1, 1], [], []>} : vector<16x128xbf16>, vector<128x96xbf16>, vector<16x96xf32> -> vector<16x96xf32>
    %45 = arith.addf %36, %44 : vector<16x96xf32>
    %cst_39 = arith.constant 0.000000e+00 : f32
    %46 = vector.broadcast %cst_39 : f32 to vector<16x96xf32>
    %47 = arith.maximumf %45, %46 : vector<16x96xf32>
    %c0_40 = arith.constant 0 : index
    %c0_41 = arith.constant 0 : index
    %c0_42 = arith.constant 0 : index
    %48 = vector.load %arg5[%c0_40, %c0_41, %c0_42] : memref<3x16x32xbf16, #tpu.memory_space<vmem>>, vector<1x16x32xbf16>
    %49 = vector.shape_cast %48 : vector<1x16x32xbf16> to vector<16x32xbf16>
    %50 = arith.truncf %28 : vector<32x128xf32> to vector<32x128xbf16>
    %cst_43 = arith.constant dense<0.000000e+00> : vector<16x128xf32>
    %51 = tpu.matmul %49, %50, %cst_43 {dimension_numbers = #tpu.dot_dimension_numbers<[1], [0], [0], [1], [0, 0, 1, 1], [], []>} : vector<16x32xbf16>, vector<32x128xbf16>, vector<16x128xf32> -> vector<16x128xf32>
    %c0_44 = arith.constant 0 : index
    %c0_45 = arith.constant 0 : index
    %c0_46 = arith.constant 0 : index
    %52 = vector.load %arg6[%c0_44, %c0_45, %c0_46] : memref<3x128x64xbf16, #tpu.memory_space<vmem>>, vector<1x128x64xbf16>
    %53 = vector.shape_cast %52 : vector<1x128x64xbf16> to vector<128x64xbf16>
    %54 = arith.truncf %51 : vector<16x128xf32> to vector<16x128xbf16>
    %cst_47 = arith.constant dense<0.000000e+00> : vector<16x64xf32>
    %55 = tpu.matmul %54, %53, %cst_47 {dimension_numbers = #tpu.dot_dimension_numbers<[1], [0], [0], [1], [0, 0, 1, 1], [], []>} : vector<16x128xbf16>, vector<128x64xbf16>, vector<16x64xf32> -> vector<16x64xf32>
    %c1_48 = arith.constant 1 : index
    %c0_49 = arith.constant 0 : index
    %c0_50 = arith.constant 0 : index
    %56 = vector.load %arg5[%c1_48, %c0_49, %c0_50] : memref<3x16x32xbf16, #tpu.memory_space<vmem>>, vector<1x16x32xbf16>
    %57 = vector.shape_cast %56 : vector<1x16x32xbf16> to vector<16x32xbf16>
    %58 = arith.truncf %28 : vector<32x128xf32> to vector<32x128xbf16>
    %cst_51 = arith.constant dense<0.000000e+00> : vector<16x128xf32>
    %59 = tpu.matmul %57, %58, %cst_51 {dimension_numbers = #tpu.dot_dimension_numbers<[1], [0], [0], [1], [0, 0, 1, 1], [], []>} : vector<16x32xbf16>, vector<32x128xbf16>, vector<16x128xf32> -> vector<16x128xf32>
    %c1_52 = arith.constant 1 : index
    %c0_53 = arith.constant 0 : index
    %c0_54 = arith.constant 0 : index
    %60 = vector.load %arg6[%c1_52, %c0_53, %c0_54] : memref<3x128x64xbf16, #tpu.memory_space<vmem>>, vector<1x128x64xbf16>
    %61 = vector.shape_cast %60 : vector<1x128x64xbf16> to vector<128x64xbf16>
    %62 = arith.truncf %59 : vector<16x128xf32> to vector<16x128xbf16>
    %cst_55 = arith.constant dense<0.000000e+00> : vector<16x64xf32>
    %63 = tpu.matmul %62, %61, %cst_55 {dimension_numbers = #tpu.dot_dimension_numbers<[1], [0], [0], [1], [0, 0, 1, 1], [], []>} : vector<16x128xbf16>, vector<128x64xbf16>, vector<16x64xf32> -> vector<16x64xf32>
    %64 = arith.addf %55, %63 : vector<16x64xf32>
    %c2_56 = arith.constant 2 : index
    %c0_57 = arith.constant 0 : index
    %c0_58 = arith.constant 0 : index
    %65 = vector.load %arg5[%c2_56, %c0_57, %c0_58] : memref<3x16x32xbf16, #tpu.memory_space<vmem>>, vector<1x16x32xbf16>
    %66 = vector.shape_cast %65 : vector<1x16x32xbf16> to vector<16x32xbf16>
    %67 = arith.truncf %28 : vector<32x128xf32> to vector<32x128xbf16>
    %cst_59 = arith.constant dense<0.000000e+00> : vector<16x128xf32>
    %68 = tpu.matmul %66, %67, %cst_59 {dimension_numbers = #tpu.dot_dimension_numbers<[1], [0], [0], [1], [0, 0, 1, 1], [], []>} : vector<16x32xbf16>, vector<32x128xbf16>, vector<16x128xf32> -> vector<16x128xf32>
    %c2_60 = arith.constant 2 : index
    %c0_61 = arith.constant 0 : index
    %c0_62 = arith.constant 0 : index
    %69 = vector.load %arg6[%c2_60, %c0_61, %c0_62] : memref<3x128x64xbf16, #tpu.memory_space<vmem>>, vector<1x128x64xbf16>
    %70 = vector.shape_cast %69 : vector<1x128x64xbf16> to vector<128x64xbf16>
    %71 = arith.truncf %68 : vector<16x128xf32> to vector<16x128xbf16>
    %cst_63 = arith.constant dense<0.000000e+00> : vector<16x64xf32>
    %72 = tpu.matmul %71, %70, %cst_63 {dimension_numbers = #tpu.dot_dimension_numbers<[1], [0], [0], [1], [0, 0, 1, 1], [], []>} : vector<16x128xbf16>, vector<128x64xbf16>, vector<16x64xf32> -> vector<16x64xf32>
    %73 = arith.addf %64, %72 : vector<16x64xf32>
    %cst_64 = arith.constant 0.000000e+00 : f32
    %74 = vector.broadcast %cst_64 : f32 to vector<16x64xf32>
    %75 = arith.maximumf %73, %74 : vector<16x64xf32>
    %c0_65 = arith.constant 0 : index
    %c0_66 = arith.constant 0 : index
    %76 = vector.load %arg7[%c0_65, %c0_66] : memref<64x96xbf16, #tpu.memory_space<vmem>>, vector<64x96xbf16>
    %77 = arith.truncf %75 : vector<16x64xf32> to vector<16x64xbf16>
    %cst_67 = arith.constant dense<0.000000e+00> : vector<16x96xf32>
    %78 = tpu.matmul %77, %76, %cst_67 {dimension_numbers = #tpu.dot_dimension_numbers<[1], [0], [0], [1], [0, 0, 1, 1], [], []>} : vector<16x64xbf16>, vector<64x96xbf16>, vector<16x96xf32> -> vector<16x96xf32>
    %cst_68 = arith.constant 0.000000e+00 : f32
    %79 = vector.broadcast %cst_68 : f32 to vector<16x96xf32>
    %80 = arith.maximumf %78, %79 : vector<16x96xf32>
    %81 = arith.addf %80, %47 : vector<16x96xf32>
    %c0_69 = arith.constant 0 : index
    %c0_70 = arith.constant 0 : index
    %c0_71 = arith.constant 0 : index
    %82 = vector.load %arg8[%c0_69, %c0_70, %c0_71] : memref<2x8x16xbf16, #tpu.memory_space<vmem>>, vector<1x8x16xbf16>
    %83 = vector.shape_cast %82 : vector<1x8x16xbf16> to vector<8x16xbf16>
    %84 = arith.truncf %81 : vector<16x96xf32> to vector<16x96xbf16>
    %cst_72 = arith.constant dense<0.000000e+00> : vector<8x96xf32>
    %85 = tpu.matmul %83, %84, %cst_72 {dimension_numbers = #tpu.dot_dimension_numbers<[1], [0], [0], [1], [0, 0, 1, 1], [], []>} : vector<8x16xbf16>, vector<16x96xbf16>, vector<8x96xf32> -> vector<8x96xf32>
    %c0_73 = arith.constant 0 : index
    %c0_74 = arith.constant 0 : index
    %c0_75 = arith.constant 0 : index
    %86 = vector.load %arg9[%c0_73, %c0_74, %c0_75] : memref<2x96x72xbf16, #tpu.memory_space<vmem>>, vector<1x96x72xbf16>
    %87 = vector.shape_cast %86 : vector<1x96x72xbf16> to vector<96x72xbf16>
    %88 = arith.truncf %85 : vector<8x96xf32> to vector<8x96xbf16>
    %cst_76 = arith.constant dense<0.000000e+00> : vector<8x72xf32>
    %89 = tpu.matmul %88, %87, %cst_76 {dimension_numbers = #tpu.dot_dimension_numbers<[1], [0], [0], [1], [0, 0, 1, 1], [], []>} : vector<8x96xbf16>, vector<96x72xbf16>, vector<8x72xf32> -> vector<8x72xf32>
    %c1_77 = arith.constant 1 : index
    %c0_78 = arith.constant 0 : index
    %c0_79 = arith.constant 0 : index
    %90 = vector.load %arg8[%c1_77, %c0_78, %c0_79] : memref<2x8x16xbf16, #tpu.memory_space<vmem>>, vector<1x8x16xbf16>
    %91 = vector.shape_cast %90 : vector<1x8x16xbf16> to vector<8x16xbf16>
    %92 = arith.truncf %81 : vector<16x96xf32> to vector<16x96xbf16>
    %cst_80 = arith.constant dense<0.000000e+00> : vector<8x96xf32>
    %93 = tpu.matmul %91, %92, %cst_80 {dimension_numbers = #tpu.dot_dimension_numbers<[1], [0], [0], [1], [0, 0, 1, 1], [], []>} : vector<8x16xbf16>, vector<16x96xbf16>, vector<8x96xf32> -> vector<8x96xf32>
    %c1_81 = arith.constant 1 : index
    %c0_82 = arith.constant 0 : index
    %c0_83 = arith.constant 0 : index
    %94 = vector.load %arg9[%c1_81, %c0_82, %c0_83] : memref<2x96x72xbf16, #tpu.memory_space<vmem>>, vector<1x96x72xbf16>
    %95 = vector.shape_cast %94 : vector<1x96x72xbf16> to vector<96x72xbf16>
    %96 = arith.truncf %93 : vector<8x96xf32> to vector<8x96xbf16>
    %cst_84 = arith.constant dense<0.000000e+00> : vector<8x72xf32>
    %97 = tpu.matmul %96, %95, %cst_84 {dimension_numbers = #tpu.dot_dimension_numbers<[1], [0], [0], [1], [0, 0, 1, 1], [], []>} : vector<8x96xbf16>, vector<96x72xbf16>, vector<8x72xf32> -> vector<8x72xf32>
    %98 = arith.addf %89, %97 : vector<8x72xf32>
    %cst_85 = arith.constant 0.000000e+00 : f32
    %99 = vector.broadcast %cst_85 : f32 to vector<8x72xf32>
    %100 = arith.maximumf %98, %99 : vector<8x72xf32>
    %c0_86 = arith.constant 0 : index
    %c0_87 = arith.constant 0 : index
    %c0_88 = arith.constant 0 : index
    %101 = vector.load %arg10[%c0_86, %c0_87, %c0_88] : memref<3x8x16xbf16, #tpu.memory_space<vmem>>, vector<1x8x16xbf16>
    %102 = vector.shape_cast %101 : vector<1x8x16xbf16> to vector<8x16xbf16>
    %103 = arith.truncf %81 : vector<16x96xf32> to vector<16x96xbf16>
    %cst_89 = arith.constant dense<0.000000e+00> : vector<8x96xf32>
    %104 = tpu.matmul %102, %103, %cst_89 {dimension_numbers = #tpu.dot_dimension_numbers<[1], [0], [0], [1], [0, 0, 1, 1], [], []>} : vector<8x16xbf16>, vector<16x96xbf16>, vector<8x96xf32> -> vector<8x96xf32>
    %c0_90 = arith.constant 0 : index
    %c0_91 = arith.constant 0 : index
    %c0_92 = arith.constant 0 : index
    %105 = vector.load %arg11[%c0_90, %c0_91, %c0_92] : memref<3x96x48xbf16, #tpu.memory_space<vmem>>, vector<1x96x48xbf16>
    %106 = vector.shape_cast %105 : vector<1x96x48xbf16> to vector<96x48xbf16>
    %107 = arith.truncf %104 : vector<8x96xf32> to vector<8x96xbf16>
    %cst_93 = arith.constant dense<0.000000e+00> : vector<8x48xf32>
    %108 = tpu.matmul %107, %106, %cst_93 {dimension_numbers = #tpu.dot_dimension_numbers<[1], [0], [0], [1], [0, 0, 1, 1], [], []>} : vector<8x96xbf16>, vector<96x48xbf16>, vector<8x48xf32> -> vector<8x48xf32>
    %c1_94 = arith.constant 1 : index
    %c0_95 = arith.constant 0 : index
    %c0_96 = arith.constant 0 : index
    %109 = vector.load %arg10[%c1_94, %c0_95, %c0_96] : memref<3x8x16xbf16, #tpu.memory_space<vmem>>, vector<1x8x16xbf16>
    %110 = vector.shape_cast %109 : vector<1x8x16xbf16> to vector<8x16xbf16>
    %111 = arith.truncf %81 : vector<16x96xf32> to vector<16x96xbf16>
    %cst_97 = arith.constant dense<0.000000e+00> : vector<8x96xf32>
    %112 = tpu.matmul %110, %111, %cst_97 {dimension_numbers = #tpu.dot_dimension_numbers<[1], [0], [0], [1], [0, 0, 1, 1], [], []>} : vector<8x16xbf16>, vector<16x96xbf16>, vector<8x96xf32> -> vector<8x96xf32>
    %c1_98 = arith.constant 1 : index
    %c0_99 = arith.constant 0 : index
    %c0_100 = arith.constant 0 : index
    %113 = vector.load %arg11[%c1_98, %c0_99, %c0_100] : memref<3x96x48xbf16, #tpu.memory_space<vmem>>, vector<1x96x48xbf16>
    %114 = vector.shape_cast %113 : vector<1x96x48xbf16> to vector<96x48xbf16>
    %115 = arith.truncf %112 : vector<8x96xf32> to vector<8x96xbf16>
    %cst_101 = arith.constant dense<0.000000e+00> : vector<8x48xf32>
    %116 = tpu.matmul %115, %114, %cst_101 {dimension_numbers = #tpu.dot_dimension_numbers<[1], [0], [0], [1], [0, 0, 1, 1], [], []>} : vector<8x96xbf16>, vector<96x48xbf16>, vector<8x48xf32> -> vector<8x48xf32>
    %117 = arith.addf %108, %116 : vector<8x48xf32>
    %c2_102 = arith.constant 2 : index
    %c0_103 = arith.constant 0 : index
    %c0_104 = arith.constant 0 : index
    %118 = vector.load %arg10[%c2_102, %c0_103, %c0_104] : memref<3x8x16xbf16, #tpu.memory_space<vmem>>, vector<1x8x16xbf16>
    %119 = vector.shape_cast %118 : vector<1x8x16xbf16> to vector<8x16xbf16>
    %120 = arith.truncf %81 : vector<16x96xf32> to vector<16x96xbf16>
    %cst_105 = arith.constant dense<0.000000e+00> : vector<8x96xf32>
    %121 = tpu.matmul %119, %120, %cst_105 {dimension_numbers = #tpu.dot_dimension_numbers<[1], [0], [0], [1], [0, 0, 1, 1], [], []>} : vector<8x16xbf16>, vector<16x96xbf16>, vector<8x96xf32> -> vector<8x96xf32>
    %c2_106 = arith.constant 2 : index
    %c0_107 = arith.constant 0 : index
    %c0_108 = arith.constant 0 : index
    %122 = vector.load %arg11[%c2_106, %c0_107, %c0_108] : memref<3x96x48xbf16, #tpu.memory_space<vmem>>, vector<1x96x48xbf16>
    %123 = vector.shape_cast %122 : vector<1x96x48xbf16> to vector<96x48xbf16>
    %124 = arith.truncf %121 : vector<8x96xf32> to vector<8x96xbf16>
    %cst_109 = arith.constant dense<0.000000e+00> : vector<8x48xf32>
    %125 = tpu.matmul %124, %123, %cst_109 {dimension_numbers = #tpu.dot_dimension_numbers<[1], [0], [0], [1], [0, 0, 1, 1], [], []>} : vector<8x96xbf16>, vector<96x48xbf16>, vector<8x48xf32> -> vector<8x48xf32>
    %126 = arith.addf %117, %125 : vector<8x48xf32>
    %cst_110 = arith.constant 0.000000e+00 : f32
    %127 = vector.broadcast %cst_110 : f32 to vector<8x48xf32>
    %128 = arith.maximumf %126, %127 : vector<8x48xf32>
    %c0_111 = arith.constant 0 : index
    %c0_112 = arith.constant 0 : index
    %129 = vector.load %arg12[%c0_111, %c0_112] : memref<48x72xbf16, #tpu.memory_space<vmem>>, vector<48x72xbf16>
    %130 = arith.truncf %128 : vector<8x48xf32> to vector<8x48xbf16>
    %cst_113 = arith.constant dense<0.000000e+00> : vector<8x72xf32>
    %131 = tpu.matmul %130, %129, %cst_113 {dimension_numbers = #tpu.dot_dimension_numbers<[1], [0], [0], [1], [0, 0, 1, 1], [], []>} : vector<8x48xbf16>, vector<48x72xbf16>, vector<8x72xf32> -> vector<8x72xf32>
    %cst_114 = arith.constant 0.000000e+00 : f32
    %132 = vector.broadcast %cst_114 : f32 to vector<8x72xf32>
    %133 = arith.maximumf %131, %132 : vector<8x72xf32>
    %134 = arith.addf %133, %100 : vector<8x72xf32>
    %c0_115 = arith.constant 0 : index
    %c0_116 = arith.constant 0 : index
    %135 = vector.load %arg13[%c0_115, %c0_116] : memref<2x8xbf16, #tpu.memory_space<vmem>>, vector<2x8xbf16>
    %136 = arith.truncf %134 : vector<8x72xf32> to vector<8x72xbf16>
    %cst_117 = arith.constant dense<0.000000e+00> : vector<2x72xf32>
    %137 = tpu.matmul %135, %136, %cst_117 {dimension_numbers = #tpu.dot_dimension_numbers<[1], [0], [0], [1], [0, 0, 1, 1], [], []>} : vector<2x8xbf16>, vector<8x72xbf16>, vector<2x72xf32> -> vector<2x72xf32>
    %c0_118 = arith.constant 0 : index
    %c0_119 = arith.constant 0 : index
    %138 = vector.load %arg14[%c0_118, %c0_119] : memref<72x10xbf16, #tpu.memory_space<vmem>>, vector<72x10xbf16>
    %139 = arith.truncf %137 : vector<2x72xf32> to vector<2x72xbf16>
    %cst_120 = arith.constant dense<0.000000e+00> : vector<2x10xf32>
    %140 = tpu.matmul %139, %138, %cst_120 {dimension_numbers = #tpu.dot_dimension_numbers<[1], [0], [0], [1], [0, 0, 1, 1], [], []>} : vector<2x72xbf16>, vector<72x10xbf16>, vector<2x10xf32> -> vector<2x10xf32>
    %c0_121 = arith.constant 0 : index
    %c0_122 = arith.constant 0 : index
    %141 = vector.load %arg15[%c0_121, %c0_122] : memref<1x10xf32, #tpu.memory_space<vmem>>, vector<1x10xf32>
    %142 = vector.broadcast %141 : vector<1x10xf32> to vector<2x10xf32>
    %143 = arith.addf %140, %142 : vector<2x10xf32>
    %c0_123 = arith.constant 0 : index
    %c0_124 = arith.constant 0 : index
    %144 = vector.load %arg16[%c0_123, %c0_124] : memref<2x10xf32, #tpu.memory_space<vmem>>, vector<2x10xf32>
    tpu.vector_store %arg16[%c0_123, %c0_124], %143 {strides = array<i32>} : memref<2x10xf32, #tpu.memory_space<vmem>>, vector<2x10xf32>,
    return
  }
}

</mosaic_0001>

<bundles_post_ra>
// kernel: resnet_forward.1
= control target key start
LH: loop header
LB: loop body
LE: loop exit
PB: predicated region body
PF: predicated region fallthrough
CT: control target
= control target key end

     0   :  { %s2683_s0 = inlined_call_operand.vmem [shape: f32[32,64], index: 0, kind: input, shape index: {}]   ;;  %s2684_s1 = inlined_call_operand.vmem [shape: bf16[3,32,32], index: 1, kind: input, shape index: {}]   ;;  %s2685_s2 = inlined_call_operand.vmem [shape: bf16[3,64,128], index: 2, kind: input, shape index: {}]   ;;  %s2686_s3 = inlined_call_operand.vmem [shape: bf16[2,16,32], index: 3, kind: input, shape index: {}]   ;;  %s2687_s4 = inlined_call_operand.vmem [shape: bf16[2,128,96], index: 4, kind: input, shape index: {}]   ;;  %s2688_s5 = inlined_call_operand.vmem [shape: bf16[3,16,32], index: 5, kind: input, shape index: {}]   ;;  %s2689_s6 = inlined_call_operand.vmem [shape: bf16[3,128,64], index: 6, kind: input, shape index: {}]   ;;  %s2690_s7 = inlined_call_operand.vmem [shape: bf16[64,96], index: 7, kind: input, shape index: {}]   ;;  %s2691_s8 = inlined_call_operand.vmem [shape: bf16[2,8,16], index: 8, kind: input, shape index: {}]   ;;  %s2692_s9 = inlined_call_operand.vmem [shape: bf16[2,96,72], index: 9, kind: input, shape index: {}]   ;;  %s2693_s10 = inlined_call_operand.vmem [shape: bf16[3,8,16], index: 10, kind: input, shape index: {}]   ;;  %s2694_s11 = inlined_call_operand.vmem [shape: bf16[3,96,48], index: 11, kind: input, shape index: {}]   ;;  %s2695_s12 = inlined_call_operand.vmem [shape: bf16[48,72], index: 12, kind: input, shape index: {}]   ;;  %s2696_s13 = inlined_call_operand.vmem [shape: bf16[2,8], index: 13, kind: input, shape index: {}]   ;;  %s2697_s14 = inlined_call_operand.vmem [shape: bf16[72,10], index: 14, kind: input, shape index: {}]   ;;  %s2698_s15 = inlined_call_operand.vmem [shape: f32[1,10], index: 15, kind: input, shape index: {}]   ;;  %s2699_s16 = inlined_call_operand.hbm [shape: f32[2,10], index: 16, kind: output, shape index: {}]  }
   0x1   :  { %2701 = sst [smem:[#allocation5_spill]] %s2683_s0 }
   0x2   :  { %s2702_s23 = sld [smem:[#allocation5_spill]] }
   0x8   :  { %v57_v0 = vld [vmem:[%s2702_s23 + $0x10] sm:$0xff]  ;;  %v58_v1 = vld [vmem:[%s2702_s23 + $0x18] sm:$0xff]  ;;  %v55_v2 = vld [vmem:[%s2702_s23] sm:$0xff] }
   0x9   :  { %v64_v3 = vpack.c.bf16 %v58_v1, %v57_v0  ;;  %v56_v4 = vld [vmem:[%s2702_s23 + $0x8] sm:$0xff] }
   0xa   :  { %v63_v5 = vpack.c.bf16 %v56_v4, %v55_v2 }
   0xb   :  { %88 = vmatpush.bf16.msra.mxu0 %v64_v3  ;;  %138 = vmatpush.bf16.msra.mxu1 %v64_v3 }
   0xc   :  { %21 = vsyncpa [#allocation3], 0  ;;  %2188 = vmatpush.bf16.msra.mxu3 %v64_v3  ;;  %v2084_v6 = vld [vmem:[%s2684_s1] sm:$0xff]  ;;  %v2090_v7 = vld [vmem:[%s2684_s1 + $0x10] sm:$0xff]  ;;  %vm75_vm0 = vcmask 261120   ;;  %vm186_vm1 = vcmask 523264  }
   0xd   :  { %v2091_v8 = vld [vmem:[%s2684_s1 + $0x18] sm:$0xff]  ;;  %v2085_v9 = vld [vmem:[%s2684_s1 + $0x8] sm:$0xff]  ;;  %v2096_v12 = vld [vmem:[%s2684_s1 + $0x20] sm:$0xff]  ;;  %vm954_vm2 = vcmask 130048   ;;  %vm1052_vm3 = vcmask 785408   ;;  %vm1399_vm4 = vcmask 392192  }
   0xe   :  { %v2095_v10 = vld [vmem:[%s2685_s2 + $0x38] sm:$0xff]  ;;  %v2097_v13 = vld [vmem:[%s2684_s1 + $0x28] sm:$0xff]  ;;  %v2094_v14 = vld [vmem:[%s2685_s2 + $0x30] sm:$0xff]  ;;  %vm1424_vm5 = vcmask 1043456   ;;  %vm1420_vm6 = vcmask 64512   ;;  %vm1482_vm7 = vcmask 588800  }
   0xf   :  { %89 = vmatpush.bf16.msra.mxu0 %v63_v5  ;;  %139 = vmatpush.bf16.msra.mxu1 %v63_v5  ;;  %v2089_v11 = vld [vmem:[%s2685_s2 + $0x18] sm:$0xff]  ;;  %v2088_v15 = vld [vmem:[%s2685_s2 + $0x10] sm:$0xff]  ;;  %v2093_v16 = vld [vmem:[%s2685_s2 + $0x28] sm:$0xff]  ;;  %s1511_s19 = sshll.u32 %s2699_s16, 4  ;;  %vm1502_vm8 = vcmask 74752   ;;  %s1512_s19 = int_to_ptr.hbm [resolvable:$true] %s1511_s19 }
  0x10   :  { %2189 = vmatpush.bf16.msra.mxu3 %v63_v5  ;;  %197 = vmatpush.bf16.msra.mxu2 %v2095_v10  ;;  %v2087_v17 = vld [vmem:[%s2685_s2 + $0x8] sm:$0xff]  ;;  %v2092_v18 = vld [vmem:[%s2685_s2 + $0x20] sm:$0xff]  ;;  %v2101_v20 = vld [vmem:[%s2685_s2 + $0x58] sm:$0xff] }
  0x11   :  { %v2086_v19 = vld [vmem:[%s2685_s2] sm:$0xff]  ;;  %v2100_v21 = vld [vmem:[%s2685_s2 + $0x50] sm:$0xff]  ;;  %v2099_v24 = vld [vmem:[%s2685_s2 + $0x48] sm:$0xff] }
  0x12   :  { %1528 = vmatmul.msk.bf16.vlgmr.msra.gmra.mxu0 %vm75_vm0, %v2084_v6  ;;  %1542 = vmatmul.msk.bf16.vlgmr.msra.gmra.mxu1 %vm75_vm0, %v2090_v7  ;;  %v2098_v25 = vld [vmem:[%s2685_s2 + $0x40] sm:$0xff]  ;;  %v2119_v42 = vld [vmem:[%s2687_s4 + $0x78] sm:$0xff]  ;;  %v2118_v43 = vld [vmem:[%s2687_s4 + $0x70] sm:$0xff] }
  0x13   :  { %288 = vmatpush.bf16.msrb.mxu0 %v64_v3  ;;  %1543 = vmatmul.msk.bf16.vlgmr.msra.gmra.mxu3 %vm75_vm0, %v2091_v8  ;;  %v2117_v44 = vld [vmem:[%s2687_s4 + $0x68] sm:$0xff]  ;;  %v2116_v45 = vld [vmem:[%s2687_s4 + $0x60] sm:$0xff]  ;;  %v2115_v46 = vld [vmem:[%s2687_s4 + $0x58] sm:$0xff] }
  0x14   :  { %246 = vmatpush.bf16.msrb.mxu3 %v2089_v11  ;;  %198 = vmatpush.bf16.msra.mxu2 %v2094_v14  ;;  %v2114_v47 = vld [vmem:[%s2687_s4 + $0x50] sm:$0xff]  ;;  %v2113_v50 = vld [vmem:[%s2687_s4 + $0x48] sm:$0xff]  ;;  %v2112_v51 = vld [vmem:[%s2687_s4 + $0x40] sm:$0xff] }
  0x15   :  { %346 = vmatpush.bf16.msrb.mxu1 %v2101_v20  ;;  %v2110_v56 = vld [vmem:[%s2687_s4 + $0x38] sm:$0xff]  ;;  %v2109_v59 = vld [vmem:[%s2687_s4 + $0x30] sm:$0xff]  ;;  %v2108_v60 = vld [vmem:[%s2687_s4 + $0x28] sm:$0xff] }
  0x16   :  { %v2107_v62 = vld [vmem:[%s2687_s4 + $0x20] sm:$0xff]  ;;  %v2129_v20 = vld [vmem:[%s2688_s5 + $0x8] sm:$0xff] }
  0x17   :  { %289 = vmatpush.bf16.msrb.mxu0 %v63_v5  ;;  %v2106_v5 = vld [vmem:[%s2687_s4 + $0x18] sm:$0xff] }
  0x18   :  { %247 = vmatpush.bf16.msrb.mxu3 %v2088_v15  ;;  %199 = vmatpush.bf16.msra.mxu2 %v2093_v16 }
  0x19   :  { %347 = vmatpush.bf16.msrb.mxu1 %v2100_v21  ;;  %v2105_v21 = vld [vmem:[%s2687_s4 + $0x10] sm:$0xff] }
  0x1b   :  { %503 = vmatpush.bf16.msra.mxu0 %v2119_v42  ;;  %v2132_v42 = vld [vmem:[%s2689_s6 + $0x50] sm:$0xff] }
  0x1c   :  { %248 = vmatpush.bf16.msrb.mxu3 %v2087_v17  ;;  %200 = vmatpush.bf16.msra.mxu2 %v2092_v18  ;;  %v2102_v17 = vld [vmem:[%s2686_s3] sm:$0xff]  ;;  %v2111_v18 = vld [vmem:[%s2686_s3 + $0x8] sm:$0xff] }
  0x1d   :  { %348 = vmatpush.bf16.msrb.mxu1 %v2099_v24  ;;  %v2137_v24 = vld [vmem:[%s2689_s6 + $0x78] sm:$0xff] }
  0x1f   :  { %504 = vmatpush.bf16.msra.mxu0 %v2118_v43  ;;  %v2123_v43 = vld [vmem:[%s2689_s6 + $0x10] sm:$0xff] }
  0x20   :  { %249 = vmatpush.bf16.msrb.mxu3 %v2086_v19  ;;  %v2120_v19 = vld [vmem:[%s2688_s5] sm:$0xff] }
  0x21   :  { %349 = vmatpush.bf16.msrb.mxu1 %v2098_v25  ;;  %v2128_v25 = vld [vmem:[%s2689_s6 + $0x38] sm:$0xff] }
  0x22   :  { %1529 = vmatmul.msk.bf16.gmra.mxu0 %vm75_vm0, %v2085_v9 }
  0x23   :  { %505 = vmatpush.bf16.msra.mxu0 %v2117_v44 }
  0x25   :  { %565 = vmatpush.bf16.msra.mxu1 %v2110_v56  ;;  %v2143_v56 = vld [vmem:[%s2689_s6 + $0xa0] sm:$0xff] }
  0x27   :  { %506 = vmatpush.bf16.msra.mxu0 %v2116_v45 }
  0x29   :  { %566 = vmatpush.bf16.msra.mxu1 %v2109_v59  ;;  %v2140_v59 = vld [vmem:[%s2689_s6 + $0x88] sm:$0xff] }
  0x2b   :  { %507 = vmatpush.bf16.msra.mxu0 %v2115_v46  ;;  %v2131_v46 = vld [vmem:[%s2689_s6 + $0x48] sm:$0xff] }
  0x2d   :  { %567 = vmatpush.bf16.msra.mxu1 %v2108_v60  ;;  %v2139_v60 = vld [vmem:[%s2689_s6 + $0x80] sm:$0xff] }
  0x2f   :  { %508 = vmatpush.bf16.msra.mxu0 %v2114_v47  ;;  %v2122_v47 = vld [vmem:[%s2689_s6 + $0x8] sm:$0xff] }
  0x31   :  { %568 = vmatpush.bf16.msra.mxu1 %v2107_v62 }
  0x32   :  { %1600 = vmatmul.msk.bf16.vlgmr.msrb.gmra.mxu0 %vm75_vm0, %v2096_v12 }
  0x33   :  { %509 = vmatpush.bf16.msra.mxu0 %v2113_v50  ;;  %v2121_v50 = vld [vmem:[%s2689_s6] sm:$0xff] }
  0x35   :  { %569 = vmatpush.bf16.msra.mxu1 %v2106_v5  ;;  %v2149_v5 = vld [vmem:[%s2690_s7 + $0x10] sm:$0xff] }
  0x37   :  { %510 = vmatpush.bf16.msra.mxu0 %v2112_v51 }
  0x39   :  { %570 = vmatpush.bf16.msra.mxu1 %v2105_v21 }
  0x42   :  { %1601 = vmatmul.msk.bf16.gmra.mxu0 %vm75_vm0, %v2097_v13 }
  0x8f   :  { %v91_v22 = vpop.f32.mrf.mxu0  ;;  %v141_v23 = vpop.f32.mrf.mxu1 }
  0x96   :  { %v146_v30 = vpop.f32.mrf.mxu3 }
  0x97   :  { %v93_v26 = vpop.f32.mrf.mxu0  ;;  %v143_v27 = vpop.f32.mrf.mxu1 }
  0x98   :  { %v109_v28 = vpack.c.bf16 %v93_v26, %v91_v22  ;;  %v160_v29 = vpack.c.bf16 %v143_v27, %v141_v23  ;;  %v2104_v22 = vld [vmem:[%s2687_s4 + $0x8] sm:$0xff]  ;;  %v2103_v23 = vld [vmem:[%s2687_s4] sm:$0xff]  ;;  %v2136_v26 = vld [vmem:[%s2689_s6 + $0x70] sm:$0xff] }
  0x99   :  { %571 = vmatpush.bf16.msra.mxu1 %v2104_v22  ;;  %v2127_v27 = vld [vmem:[%s2689_s6 + $0x30] sm:$0xff] }
  0x9a   :  { %1568 = vmatmul.msk.bf16.vlgmr.msra.gmra.mxu2 %vm186_vm1, %v160_v29  ;;  %1586 = vmatmul.msk.bf16.vlgmr.msrb.gmra.mxu3 %vm186_vm1, %v109_v28  ;;  %v2146_v28 = vld [vmem:[%s2689_s6 + $0xb8] sm:$0xff] }
  0x9d   :  { %572 = vmatpush.bf16.msra.mxu1 %v2103_v23 }
  0x9e   :  { %v148_v32 = vpop.f32.mrf.mxu3 }
  0x9f   :  { %v96_v31 = vpop.f32.mrf.mxu0  ;;  %v161_v33 = vpack.c.bf16 %v148_v32, %v146_v30  ;;  %v2126_v32 = vld [vmem:[%s2689_s6 + $0x28] sm:$0xff] }
  0xa7   :  { %v98_v34 = vpop.f32.mrf.mxu0 }
  0xa8   :  { %v110_v35 = vpack.c.bf16 %v98_v34, %v96_v31  ;;  %v2135_v31 = vld [vmem:[%s2689_s6 + $0x68] sm:$0xff]  ;;  %v2125_v34 = vld [vmem:[%s2689_s6 + $0x20] sm:$0xff] }
  0xaa   :  { %1569 = vmatmul.msk.bf16.gmra.mxu2 %vm186_vm1, %v161_v33  ;;  %1587 = vmatmul.msk.bf16.gmra.mxu3 %vm186_vm1, %v110_v35  ;;  %v2134_v33 = vld [vmem:[%s2689_s6 + $0x60] sm:$0xff] }
  0xaf   :  { %v291_v36 = vpop.f32.mrf.mxu0 }
  0xb7   :  { %v293_v37 = vpop.f32.mrf.mxu0 }
  0xb8   :  { %v310_v38 = vpack.c.bf16 %v293_v37, %v291_v36 }
  0xba   :  { %1626 = vmatmul.msk.bf16.vlgmr.msrb.gmra.mxu1 %vm186_vm1, %v310_v38 }
  0xbb   :  { %880 = vmatpush.bf16.msrb.mxu1 %v2146_v28 }
  0xbf   :  { %v296_v39 = vpop.f32.mrf.mxu0 }
  0xc7   :  { %v298_v40 = vpop.f32.mrf.mxu0 }
  0xc8   :  { %v311_v41 = vpack.c.bf16 %v298_v40, %v296_v39  ;;  %v2138_v39 = vld [vmem:[%s2688_s5 + $0x10] sm:$0xff]  ;;  %v2133_v40 = vld [vmem:[%s2689_s6 + $0x58] sm:$0xff] }
  0xca   :  { %1627 = vmatmul.msk.bf16.gmra.mxu1 %vm186_vm1, %v311_v41  ;;  %v2124_v41 = vld [vmem:[%s2689_s6 + $0x18] sm:$0xff] }
 0x11d   :  { %v202_v48 = vpop.f32.mrf.mxu2  ;;  %v251_v49 = vpop.f32.mrf.mxu3 }
 0x11e   :  { %v252_v7 = vadd.f32 %v251_v49, %v202_v48  ;;  %v2145_v48 = vld [vmem:[%s2689_s6 + $0xb0] sm:$0xff]  ;;  %v2130_v49 = vld [vmem:[%s2689_s6 + $0x40] sm:$0xff] }
 0x11f   :  { %881 = vmatpush.bf16.msrb.mxu1 %v2145_v48  ;;  %v2157_v48 = vld [vmem:[%s2692_s9 + $0x30] sm:$0xff] }
 0x125   :  { %v204_v52 = vpop.f32.mrf.mxu2  ;;  %v253_v53 = vpop.f32.mrf.mxu3 }
 0x126   :  { %v254_v2 = vadd.f32 %v253_v53, %v204_v52 }
 0x12d   :  { %v207_v57 = vpop.f32.mrf.mxu2  ;;  %v256_v58 = vpop.f32.mrf.mxu3 }
 0x12e   :  { %v257_v1 = vadd.f32 %v256_v58, %v207_v57  ;;  %v2142_v57 = vld [vmem:[%s2689_s6 + $0x98] sm:$0xff]  ;;  %v2141_v58 = vld [vmem:[%s2689_s6 + $0x90] sm:$0xff] }
 0x135   :  { %v209_v63 = vpop.f32.mrf.mxu2  ;;  %v258_v0 = vpop.f32.mrf.mxu3 }
 0x136   :  { %v259_v3 = vadd.f32 %v258_v0, %v209_v63 }
 0x137   :  { %v351_v54 = vpop.f32.mrf.mxu1 }
 0x138   :  { %v361_v10 = vadd.f32 %v351_v54, %v252_v7  ;;  %v2147_v7 = vld [vmem:[%s2690_s7] sm:$0xff] }
 0x13a   :  { %v365_v15 = vmax.f32 %v361_v10, 0.0 }
 0x13f   :  { %v353_v55 = vpop.f32.mrf.mxu1 }
 0x140   :  { %v362_v8 = vadd.f32 %v353_v55, %v254_v2  ;;  %v2144_v55 = vld [vmem:[%s2689_s6 + $0xa8] sm:$0xff] }
 0x141   :  { %882 = vmatpush.bf16.msrb.mxu1 %v2144_v55  ;;  %v2165_v55 = vld [vmem:[%s2694_s11 + $0x10] sm:$0xff] }
 0x142   :  { %v366_v13 = vmax.f32 %v362_v8, 0.0 }
 0x144   :  { %v371_v16 = vpack.c.bf16 %v366_v13, %v365_v15 }
 0x145   :  { %883 = vmatpush.bf16.msrb.mxu1 %v2143_v56  ;;  %v2171_v56 = vld [vmem:[%s2694_s11 + $0x40] sm:$0xff] }
 0x147   :  { %v356_v61 = vpop.f32.mrf.mxu1 }
 0x148   :  { %v363_v4 = vadd.f32 %v356_v61, %v257_v1 }
 0x149   :  { %884 = vmatpush.bf16.msrb.mxu1 %v2142_v57  ;;  %v2180_v57 = vld [vmem:[%s2694_s11 + $0x88] sm:$0xff] }
 0x14a   :  { %v367_v11 = vmax.f32 %v363_v4, 0.0  ;;  %v2150_v4 = vld [vmem:[%s2690_s7 + $0x18] sm:$0xff] }
 0x14d   :  { %885 = vmatpush.bf16.msrb.mxu1 %v2141_v58  ;;  %v2164_v58 = vld [vmem:[%s2694_s11 + $0x8] sm:$0xff] }
 0x14f   :  { %v358_v6 = vpop.f32.mrf.mxu1 }
 0x150   :  { %v364_v9 = vadd.f32 %v358_v6, %v259_v3  ;;  %v2148_v6 = vld [vmem:[%s2690_s7 + $0x8] sm:$0xff] }
 0x151   :  { %886 = vmatpush.bf16.msrb.mxu1 %v2140_v59  ;;  %v2170_v59 = vld [vmem:[%s2694_s11 + $0x38] sm:$0xff] }
 0x152   :  { %v368_v12 = vmax.f32 %v364_v9, 0.0 }
 0x154   :  { %v372_v14 = vpack.c.bf16 %v368_v12, %v367_v11 }
 0x155   :  { %887 = vmatpush.bf16.msrb.mxu1 %v2139_v60  ;;  %v2179_v60 = vld [vmem:[%s2694_s11 + $0x80] sm:$0xff] }
 0x156   :  { %387 = vmatpush.bf16.msrb.mxu2 %v372_v14  ;;  %429 = vmatpush.bf16.msra.mxu3 %v372_v14 }
 0x157   :  { %806 = vmatpush.bf16.msrb.mxu0 %v372_v14 }
 0x15a   :  { %388 = vmatpush.bf16.msrb.mxu2 %v371_v16  ;;  %430 = vmatpush.bf16.msra.mxu3 %v371_v16 }
 0x15b   :  { %807 = vmatpush.bf16.msrb.mxu0 %v371_v16 }
 0x15d   :  { %1632 = vmatmul.msk.bf16.vlgmr.msrb.gmra.mxu2 %vm75_vm0, %v2102_v17  ;;  %1639 = vmatmul.msk.bf16.vlgmr.msra.gmra.mxu3 %vm75_vm0, %v2111_v18 }
 0x15e   :  { %597 = vmatpush.bf16.msra.mxu2 %v372_v14  ;;  %639 = vmatpush.bf16.msrb.mxu3 %v372_v14 }
 0x162   :  { %598 = vmatpush.bf16.msra.mxu2 %v371_v16  ;;  %640 = vmatpush.bf16.msrb.mxu3 %v371_v16 }
 0x166   :  { %713 = vmatpush.bf16.msrb.mxu2 %v2137_v24  ;;  %775 = vmatpush.bf16.msra.mxu3 %v2128_v25 }
 0x16a   :  { %714 = vmatpush.bf16.msrb.mxu2 %v2136_v26  ;;  %776 = vmatpush.bf16.msra.mxu3 %v2127_v27 }
 0x16d   :  { %1724 = vmatmul.msk.bf16.vlgmr.msra.gmra.mxu2 %vm75_vm0, %v2120_v19  ;;  %1731 = vmatmul.msk.bf16.vlgmr.msrb.gmra.mxu3 %vm75_vm0, %v2129_v20 }
 0x16e   :  { %715 = vmatpush.bf16.msrb.mxu2 %v2135_v31  ;;  %777 = vmatpush.bf16.msra.mxu3 %v2126_v32  ;;  %v952_v32 = vld [vmem:[%s2691_s8] sm:$0xf] }
 0x172   :  { %716 = vmatpush.bf16.msrb.mxu2 %v2134_v33  ;;  %778 = vmatpush.bf16.msra.mxu3 %v2125_v34  ;;  %v1885_v33 = vld [vmem:[%s2691_s8 + $0x4] sm:$0xf]  ;;  %v2156_v34 = vld [vmem:[%s2692_s9 + $0x28] sm:$0xff] }
 0x176   :  { %717 = vmatpush.bf16.msrb.mxu2 %v2133_v40  ;;  %779 = vmatpush.bf16.msra.mxu3 %v2124_v41  ;;  %v2153_v40 = vld [vmem:[%s2692_s9 + $0x10] sm:$0xff]  ;;  %v2159_v41 = vld [vmem:[%s2692_s9 + $0x40] sm:$0xff] }
 0x17a   :  { %718 = vmatpush.bf16.msrb.mxu2 %v2132_v42  ;;  %780 = vmatpush.bf16.msra.mxu3 %v2123_v43  ;;  %v1122_v42 = vld [vmem:[%s2693_s10] sm:$0xf]  ;;  %v1950_v43 = vld [vmem:[%s2693_s10 + $0x4] sm:$0xf] }
 0x17e   :  { %719 = vmatpush.bf16.msrb.mxu2 %v2131_v46  ;;  %781 = vmatpush.bf16.msra.mxu3 %v2122_v47  ;;  %v2014_v46 = vld [vmem:[%s2693_s10 + $0x8] sm:$0xf]  ;;  %v2158_v47 = vld [vmem:[%s2692_s9 + $0x38] sm:$0xff]  ;;  %s2218_s10 = smov [#allocation2]  }
 0x17f   :  { %s1509_s17 = sshll.u32 %s2218_s10, 4  ;;  %s1510_s17 = int_to_ptr.vmem [resolvable:$true] %s1509_s17 }
 0x182   :  { %720 = vmatpush.bf16.msrb.mxu2 %v2130_v49  ;;  %782 = vmatpush.bf16.msra.mxu3 %v2121_v50  ;;  %v2168_v49 = vld [vmem:[%s2694_s11 + $0x28] sm:$0xff]  ;;  %v2174_v50 = vld [vmem:[%s2694_s11 + $0x58] sm:$0xff] }
 0x1e0   :  { %v390_v29 = vpop.f32.mrf.mxu2  ;;  %v432_v30 = vpop.f32.mrf.mxu3 }
 0x1e8   :  { %v392_v35 = vpop.f32.mrf.mxu2  ;;  %v434_v36 = vpop.f32.mrf.mxu3 }
 0x1e9   :  { %v411_v37 = vpack.c.bf16 %v392_v35, %v390_v29  ;;  %v454_v38 = vpack.c.bf16 %v434_v36, %v432_v30  ;;  %v2162_v35 = vld [vmem:[%s2692_s9 + $0x58] sm:$0xff]  ;;  %v2155_v36 = vld [vmem:[%s2692_s9 + $0x20] sm:$0xff] }
 0x1eb   :  { %511 = vmatmul.bf16.vlgmr.msra.gmra.mxu0 %v454_v38  ;;  %573 = vmatmul.bf16.vlgmr.msra.gmra.mxu1 %v411_v37  ;;  %v2161_v37 = vld [vmem:[%s2692_s9 + $0x50] sm:$0xff]  ;;  %v2154_v38 = vld [vmem:[%s2692_s9 + $0x18] sm:$0xff] }
 0x1ec   :  { %938 = vmatpush.bf16.msra.mxu0 %v2150_v4  ;;  %1110 = vmatpush.bf16.msra.mxu1 %v2156_v34 }
 0x1f0   :  { %v600_v44 = vpop.f32.mrf.mxu2  ;;  %v642_v45 = vpop.f32.mrf.mxu3  ;;  %939 = vmatpush.bf16.msra.mxu0 %v2149_v5  ;;  %1111 = vmatpush.bf16.msra.mxu1 %v2155_v36  ;;  %v1449_v36 = vld [vmem:[%s2697_s14 + $0x20] sm:$0xf] }
 0x1f4   :  { %940 = vmatpush.bf16.msra.mxu0 %v2148_v6  ;;  %1112 = vmatpush.bf16.msra.mxu1 %v2154_v38 }
 0x1f8   :  { %v602_v51 = vpop.f32.mrf.mxu2  ;;  %v644_v52 = vpop.f32.mrf.mxu3  ;;  %941 = vmatpush.bf16.msra.mxu0 %v2147_v7  ;;  %1113 = vmatpush.bf16.msra.mxu1 %v2153_v40  ;;  %v2187_v40 = vld [vmem:[%s2697_s14 + $0x18] sm:$0xff] }
 0x1f9   :  { %v621_v53 = vpack.c.bf16 %v602_v51, %v600_v44  ;;  %v664_v54 = vpack.c.bf16 %v644_v52, %v642_v45  ;;  %v2152_v44 = vld [vmem:[%s2692_s9 + $0x8] sm:$0xff]  ;;  %v2151_v45 = vld [vmem:[%s2692_s9] sm:$0xff]  ;;  %v2173_v52 = vld [vmem:[%s2694_s11 + $0x50] sm:$0xff] }
 0x1fa   :  { %v2167_v51 = vld [vmem:[%s2694_s11 + $0x20] sm:$0xff] }
 0x1fb   :  { %1818 = vmatmul.msk.bf16.vlgmr.msrb.gmra.mxu0 %vm75_vm0, %v2138_v39  ;;  %721 = vmatmul.bf16.vlgmr.msrb.gmra.mxu2 %v664_v54  ;;  %v2160_v39 = vld [vmem:[%s2692_s9 + $0x48] sm:$0xff] }
 0x1fc   :  { %783 = vmatmul.bf16.vlgmr.msra.gmra.mxu3 %v621_v53  ;;  %1058 = vmatpush.bf16.msrb.mxu0 %v2162_v35  ;;  %v2166_v53 = vld [vmem:[%s2694_s11 + $0x18] sm:$0xff]  ;;  %v2172_v54 = vld [vmem:[%s2694_s11 + $0x48] sm:$0xff] }
 0x1fd   :  { %1114 = vmatpush.bf16.msra.mxu1 %v2152_v44 }
 0x200   :  { %1059 = vmatpush.bf16.msrb.mxu0 %v2161_v37  ;;  %v1472_v37 = vunpack.c.l.b16 %v1449_v36 }
 0x201   :  { %1115 = vmatpush.bf16.msra.mxu1 %v2151_v45 }
 0x202   :  { %v1477_v38 = vpack.c.b16 %v1472_v37, %v1472_v37 }
 0x204   :  { %1060 = vmatpush.bf16.msrb.mxu0 %v2160_v39  ;;  %v1487_v39 = vsel %vm1424_vm5, %v1477_v38, 0 }
 0x208   :  { %1061 = vmatpush.bf16.msrb.mxu0 %v2159_v41  ;;  %v2186_v41 = vld [vmem:[%s2697_s14 + $0x10] sm:$0xff] }
 0x20c   :  { %1062 = vmatpush.bf16.msrb.mxu0 %v2158_v47 }
 0x210   :  { %1063 = vmatpush.bf16.msrb.mxu0 %v2157_v48 }
 0x268   :  { %v512_v61 = vpop.f32.mrf.mxu0  ;;  %v574_v62 = vpop.f32.mrf.mxu1 }
 0x269   :  { %v575_v63 = vadd.f32 %v574_v62, %v512_v61  ;;  %v2163_v61 = vld [vmem:[%s2694_s11] sm:$0xff]  ;;  %v2169_v62 = vld [vmem:[%s2694_s11 + $0x30] sm:$0xff] }
 0x26b   :  { %v579_v26 = vmax.f32 %v575_v63, 0.0  ;;  %v2178_v63 = vld [vmem:[%s2694_s11 + $0x78] sm:$0xff] }
 0x270   :  { %v514_v0 = vpop.f32.mrf.mxu0  ;;  %v576_v8 = vpop.f32.mrf.mxu1 }
 0x271   :  { %v577_v23 = vadd.f32 %v576_v8, %v514_v0  ;;  %v2177_v0 = vld [vmem:[%s2694_s11 + $0x70] sm:$0xff] }
 0x273   :  { %v580_v27 = vmax.f32 %v577_v23, 0.0 }
 0x278   :  { %v809_v1 = vpop.f32.mrf.mxu0 }
 0x27e   :  { %v722_v9 = vpop.f32.mrf.mxu2 }
 0x27f   :  { %v784_v10 = vpop.f32.mrf.mxu3 }
 0x280   :  { %v811_v2 = vpop.f32.mrf.mxu0  ;;  %v785_v14 = vadd.f32 %v784_v10, %v722_v9 }
 0x281   :  { %v831_v3 = vpack.c.bf16 %v811_v2, %v809_v1  ;;  %v2176_v1 = vld [vmem:[%s2694_s11 + $0x68] sm:$0xff]  ;;  %v2175_v2 = vld [vmem:[%s2694_s11 + $0x60] sm:$0xff] }
 0x283   :  { %888 = vmatmul.bf16.vlgmr.msrb.gmra.mxu1 %v831_v3 }
 0x284   :  { %1277 = vmatpush.bf16.msrb.mxu1 %v2168_v49 }
 0x286   :  { %v724_v12 = vpop.f32.mrf.mxu2 }
 0x287   :  { %v786_v13 = vpop.f32.mrf.mxu3 }
 0x288   :  { %v787_v16 = vadd.f32 %v786_v13, %v724_v12  ;;  %1278 = vmatpush.bf16.msrb.mxu1 %v2167_v51  ;;  %v2184_v51 = vld [vmem:[%s2697_s14] sm:$0xff] }
 0x28c   :  { %1279 = vmatpush.bf16.msrb.mxu1 %v2166_v53 }
 0x290   :  { %1280 = vmatpush.bf16.msrb.mxu1 %v2165_v55  ;;  %v2191_v55 = vld [vmem:[%s2698_s15] ss:$0 sm:$0xff] }
 0x294   :  { %1281 = vmatpush.bf16.msrb.mxu1 %v2164_v58 }
 0x298   :  { %1282 = vmatpush.bf16.msrb.mxu1 %v2163_v61 }
 0x300   :  { %v889_v11 = vpop.f32.mrf.mxu1 }
 0x301   :  { %v894_v15 = vadd.f32 %v889_v11, %v785_v14 }
 0x303   :  { %v896_v19 = vmax.f32 %v894_v15, 0.0 }
 0x308   :  { %v891_v17 = vpop.f32.mrf.mxu1 }
 0x309   :  { %v895_v18 = vadd.f32 %v891_v17, %v787_v16 }
 0x30b   :  { %v897_v20 = vmax.f32 %v895_v18, 0.0  ;;  %v2183_v18 = vld [vmem:[%s2695_s12 + $0x10] sm:$0xff] }
 0x30d   :  { %v906_v21 = vpack.c.bf16 %v897_v20, %v896_v19 }
 0x30f   :  { %1883 = vmatmul.msk.bf16.vlgmr.msra.gmra.mxu0 %vm186_vm1, %v906_v21 }
 0x310   :  { %1225 = vmatpush.bf16.msra.mxu0 %v2174_v50  ;;  %v1418_v50 = vld [vmem:[%s2696_s13] sm:$0x1] }
 0x314   :  { %1226 = vmatpush.bf16.msra.mxu0 %v2173_v52 }
 0x318   :  { %1227 = vmatpush.bf16.msra.mxu0 %v2172_v54 }
 0x31c   :  { %1228 = vmatpush.bf16.msra.mxu0 %v2171_v56 }
 0x320   :  { %1229 = vmatpush.bf16.msra.mxu0 %v2170_v59 }
 0x324   :  { %1230 = vmatpush.bf16.msra.mxu0 %v2169_v62 }
 0x38c   :  { %v943_v22 = vpop.f32.mrf.mxu0 }
 0x38d   :  { %v948_v24 = vmax.f32 %v943_v22, 0.0  ;;  %v2182_v22 = vld [vmem:[%s2695_s12 + $0x8] sm:$0xff] }
 0x38f   :  { %v950_v29 = vadd.f32 %v948_v24, %v579_v26 }
 0x394   :  { %v945_v25 = vpop.f32.mrf.mxu0 }
 0x395   :  { %v949_v28 = vmax.f32 %v945_v25, 0.0  ;;  %v2181_v25 = vld [vmem:[%s2695_s12] sm:$0xff] }
 0x397   :  { %v951_v30 = vadd.f32 %v949_v28, %v580_v27 }
 0x399   :  { %v953_v31 = vpack.c.bf16 %v951_v30, %v950_v29 }
 0x39b   :  { %965 = vmatpush.bf16.msra.mxu2 %v953_v31  ;;  %996 = vmatpush.bf16.msrb.mxu3 %v953_v31 }
 0x39e   :  { %1884 = vmatmul.msk.bf16.vlgmr.msra.gmra.mxu2 %vm954_vm2, %v952_v32  ;;  %1886 = vmatmul.msk.bf16.vlgmr.msrb.gmra.mxu3 %vm954_vm2, %v1885_v33 }
 0x39f   :  { %1133 = vmatpush.bf16.msrb.mxu2 %v953_v31  ;;  %1164 = vmatpush.bf16.msra.mxu3 %v953_v31 }
 0x3a3   :  { %1300 = vmatpush.bf16.msra.mxu2 %v953_v31  ;;  %1361 = vmatpush.bf16.msrb.mxu3 %v2180_v57 }
 0x3a7   :  { %1362 = vmatpush.bf16.msrb.mxu3 %v2179_v60 }
 0x3ab   :  { %1363 = vmatpush.bf16.msrb.mxu3 %v2178_v63 }
 0x3ae   :  { %1949 = vmatmul.msk.bf16.vlgmr.msrb.gmra.mxu2 %vm954_vm2, %v1122_v42  ;;  %1951 = vmatmul.msk.bf16.vlgmr.msra.gmra.mxu3 %vm954_vm2, %v1950_v43  ;;  %v2185_v42 = vld [vmem:[%s2697_s14 + $0x8] sm:$0xff] }
 0x3af   :  { %1364 = vmatpush.bf16.msrb.mxu3 %v2177_v0  ;;  %1408 = vmatpush.bf16.msrb.mxu2 %v2183_v18 }
 0x3b3   :  { %1365 = vmatpush.bf16.msrb.mxu3 %v2176_v1  ;;  %1409 = vmatpush.bf16.msrb.mxu2 %v2182_v22 }
 0x3b7   :  { %1366 = vmatpush.bf16.msrb.mxu3 %v2175_v2  ;;  %1410 = vmatpush.bf16.msrb.mxu2 %v2181_v25 }
 0x3be   :  { %2015 = vmatmul.msk.bf16.vlgmr.msra.gmra.mxu2 %vm954_vm2, %v2014_v46 }
 0x421   :  { %v967_v3 = vpop.f32.mrf.mxu2  ;;  %v998_v4 = vpop.f32.mrf.mxu3 }
 0x422   :  { %v983_v5 = vpack.c.bf16 %v967_v3, %v967_v3  ;;  %v1015_v6 = vpack.c.bf16 %v998_v4, %v998_v4 }
 0x424   :  { %1948 = vmatmul.msk.bf16.vlgmr.msra.gmra.mxu1 %vm1052_vm3, %v983_v5  ;;  %1923 = vmatmul.msk.bf16.vlgmr.msrb.gmra.mxu0 %vm1052_vm3, %v1015_v6 }
 0x425   :  { %1492 = vmatpush.bf16.msra.mxu1 %v1487_v39 }
 0x429   :  { %v969_v7 = vpop.f32.mrf.mxu2  ;;  %v1000_v8 = vpop.f32.mrf.mxu3  ;;  %1493 = vmatpush.bf16.msra.mxu1 %v2187_v40 }
 0x42d   :  { %1494 = vmatpush.bf16.msra.mxu1 %v2186_v41 }
 0x431   :  { %v1135_v9 = vpop.f32.mrf.mxu2  ;;  %v1166_v10 = vpop.f32.mrf.mxu3  ;;  %1495 = vmatpush.bf16.msra.mxu1 %v2185_v42 }
 0x432   :  { %v1151_v11 = vpack.c.bf16 %v1135_v9, %v1135_v9  ;;  %v1183_v12 = vpack.c.bf16 %v1166_v10, %v1166_v10 }
 0x434   :  { %2013 = vmatmul.msk.bf16.vlgmr.msrb.gmra.mxu1 %vm1052_vm3, %v1151_v11  ;;  %1988 = vmatmul.msk.bf16.vlgmr.msra.gmra.mxu0 %vm1052_vm3, %v1183_v12 }
 0x435   :  { %1496 = vmatpush.bf16.msra.mxu1 %v2184_v51 }
 0x439   :  { %v1137_v13 = vpop.f32.mrf.mxu2  ;;  %v1168_v14 = vpop.f32.mrf.mxu3 }
 0x441   :  { %v1302_v15 = vpop.f32.mrf.mxu2 }
 0x442   :  { %v1319_v16 = vpack.c.bf16 %v1302_v15, %v1302_v15 }
 0x444   :  { %2052 = vmatmul.msk.bf16.vlgmr.msrb.gmra.mxu3 %vm1052_vm3, %v1319_v16 }
 0x449   :  { %v1304_v17 = vpop.f32.mrf.mxu2 }
 0x4a1   :  { %v1117_v19 = vpop.f32.mrf.mxu1  ;;  %v1065_v20 = vpop.f32.mrf.mxu0 }
 0x4a2   :  { %v1118_v21 = vadd.f32 %v1117_v19, %v1065_v20 }
 0x4a4   :  { %v1121_v44 = vmax.f32 %v1118_v21, 0.0 }
 0x4a9   :  { %v1119_v23 = vpop.f32.mrf.mxu1  ;;  %v1067_v24 = vpop.f32.mrf.mxu0 }
 0x4b1   :  { %v1284_v26 = vpop.f32.mrf.mxu1  ;;  %v1232_v27 = vpop.f32.mrf.mxu0 }
 0x4b2   :  { %v1285_v30 = vadd.f32 %v1284_v26, %v1232_v27 }
 0x4b9   :  { %v1286_v28 = vpop.f32.mrf.mxu1  ;;  %v1234_v29 = vpop.f32.mrf.mxu0 }
 0x4c7   :  { %v1368_v31 = vpop.f32.mrf.mxu3 }
 0x4c8   :  { %v1372_v32 = vadd.f32 %v1368_v31, %v1285_v30 }
 0x4ca   :  { %v1373_v33 = vmax.f32 %v1372_v32, 0.0 }
 0x4cc   :  { %v1380_v34 = vpack.c.bf16 %v1373_v33, %v1373_v33 }
 0x4ce   :  { %2065 = vmatmul.msk.bf16.vlgmr.msrb.gmra.mxu2 %vm1399_vm4, %v1380_v34 }
 0x4cf   :  { %v1370_v35 = vpop.f32.mrf.mxu3 }
 0x551   :  { %v1412_v43 = vpop.f32.mrf.mxu2 }
 0x552   :  { %v1416_v45 = vmax.f32 %v1412_v43, 0.0 }
 0x554   :  { %v1417_v46 = vadd.f32 %v1416_v45, %v1121_v44 }
 0x556   :  { %v1419_v47 = vpack.c.bf16 %v1417_v46, %v1417_v46 }
 0x558   :  { %v1426_v48 = vsel %vm1424_vm5, %v1419_v47, 0 }
 0x559   :  { %v1414_v49 = vpop.f32.mrf.mxu2  ;;  %1435 = vmatpush.bf16.msrb.mxu0 %v1426_v48 }
 0x55c   :  { %2066 = vmatmul.msk.bf16.vlgmr.msrb.gmra.mxu0 %vm1420_vm6, %v1418_v50 }
 0x5d9   :  { %v1437_v52 = vpop.f32.mrf.mxu0 }
 0x5da   :  { %v1450_v53 = vpack.c.bf16 %v1437_v52, %v1437_v52 }
 0x5dc   :  { %2083 = vmatmul.msk.bf16.vlgmr.msra.gmra.mxu1 %vm1482_vm7, %v1450_v53 }
 0x5e1   :  { %v1439_v54 = vpop.f32.mrf.mxu0 }
 0x659   :  { %v1498_v56 = vpop.f32.mrf.mxu1 }
 0x65a   :  { %v1499_v57 = vadd.f32 %v2191_v55, %v1498_v56 }
 0x65c   :  { %1503 = vst.msk [vmem:[#allocation2] sm:$0x3] %vm1502_vm8, %v1499_v57 }
 0x65d   :  { %1514 = dma.vmem_to_hbm [thread:$0]  %s1510_s17, 32, %s1512_s19, [#allocation3]  }
 0x661   :  { %v1500_v58 = vpop.f32.mrf.mxu1 }
 0x662   :  { %2216 = dma.done.wait [#allocation3], 32  }
 0x663   :  { %2217 = vsyncadd [#allocation3], 4294967264 }
 0x664   :  { %1519 = vsyncpa [#allocation3], 1 }

</bundles_post_ra>
